<compile_context>
chip_gen: v5e
topology: v5e:2x2
jax: 0.10.0
libtpu: 0.0.40
codegen_flags: <defaults>
</compile_context>

<pallas_src>
import functools

import jax
import jax.numpy as jnp
from jax import lax
from jax.experimental import pallas as pl
from jax.experimental.pallas import tpu as pltpu

_NEG_BIG = -1e30  # large finite negative for the diagonal mask (safer than -inf)


def _l2_normalize_kernel(x_ref, out_ref):
    """Row-wise L2 normalize, matching F.normalize(..., dim=-1, eps=1e-12)."""
    x = x_ref[...].astype(jnp.float32)
    sumsq = jnp.sum(x * x, axis=-1, keepdims=True)
    # 1 / max(||x||, 1e-12)  ==  rsqrt(max(sumsq, 1e-24));  rsqrt -> EUP slot.
    inv = lax.rsqrt(jnp.maximum(sumsq, 1e-24))
    out_ref[...] = (x * inv).astype(out_ref.dtype)


def _ntxent_tiles_kernel(q_ref, k_ref, p_ref, out_ref, m_sc, l_sc, *,
                         tq, tk, inv_temp):
    i = pl.program_id(0)          # row tile  (parallel)
    j = pl.program_id(1)          # col tile  (reduction, arbitrary)
    n_j = pl.num_programs(1)

    @pl.when(j == 0)
    def _():
        m_sc[...] = jnp.full(m_sc.shape, _NEG_BIG, jnp.float32)
        l_sc[...] = jnp.zeros(l_sc.shape, jnp.float32)

    q = q_ref[...]                # [tq, D], input dtype (f32 or bf16)
    k = k_ref[...]                # [tk, D]

    # Fold 1/temperature into the small query tile (O(Tq*D), not O(Tq*Tk)).
    q_scaled = (q.astype(jnp.float32) * inv_temp).astype(q.dtype)

    # sim tile on the MXU: contract last dims of both operands (no transpose).
    s = lax.dot_general(q_scaled, k, (((1,), (1,)), ((), ())),
                        preferred_element_type=jnp.float32)      # [tq, tk] f32

    # Diagonal mask with per-tile index vectors (broadcast compare).
    row_ids = i * tq + lax.broadcasted_iota(jnp.int32, (tq, 1), 0)
    col_ids = j * tk + lax.broadcasted_iota(jnp.int32, (1, tk), 1)
    s = jnp.where(row_ids == col_ids, _NEG_BIG, s)

    # Online log-sum-exp update.
    m_prev = m_sc[...]
    m_new = jnp.maximum(m_prev, jnp.max(s, axis=-1, keepdims=True))
    alpha = jnp.exp(m_prev - m_new)
    l_sc[...] = alpha * l_sc[...] + jnp.sum(jnp.exp(s - m_new),
                                            axis=-1, keepdims=True)
    m_sc[...] = m_new

    @pl.when(j == n_j - 1)
    def _():
        lse = m_sc[...] + jnp.log(l_sc[...])                     # [tq, 1]
        # Positive-pair logit: dot(x[r], x[(r+B) % N]) / T, elementwise in f32.
        qf = q_ref[...].astype(jnp.float32)
        pf = p_ref[...].astype(jnp.float32)
        picked = jnp.sum(qf * pf, axis=-1, keepdims=True) * inv_temp
        out_ref[...] = (lse - picked).astype(out_ref.dtype)


def _pick_row_tile(b, max_tile=256):
    """Largest multiple of 8 that is <= min(max_tile, b) and divides b."""
    best = 0
    for t in range(8, min(max_tile, b) + 1, 8):
        if b % t == 0:
            best = t
    if best == 0:
        # TODO(synk): pad N to a multiple of 16 (with masked rows) to support
        # batch sizes that are not a multiple of 8.
        raise ValueError(
            "NTXent Pallas kernel requires batch_size (= reps.shape[0] // 2) "
            f"to be a multiple of 8; got batch_size={b}.")
    return best


def ntxent_loss(reps, temperature=0.5, use_cosine_similarity=True):
    """reps: [N, D] float array with N = 2 * batch_size."""
    n, d = reps.shape
    assert n % 2 == 0, "reps must have an even number of rows (2 * batch)."
    b = n // 2

    tq = _pick_row_tile(b)        # row tile; divides B (partner tiles align)
    tk = tq                       # col tile; divides N since tq | B | N
    nrt = n // tq                 # number of row tiles
    nct = n // tk                 # number of col tiles
    half = b // tq                # partner tile offset (rows shift by B)

    # Pass 1: row-wise L2 normalization (only if cosine similarity is used).
    if use_cosine_similarity:
        x = pl.pallas_call(
            _l2_normalize_kernel,
            out_shape=jax.ShapeDtypeStruct((n, d), reps.dtype),
            grid_spec=pltpu.PrefetchScalarGridSpec(
                num_scalar_prefetch=0,
                grid=(nrt,),
                in_specs=[pl.BlockSpec((tq, d), lambda i: (i, 0))],
                out_specs=pl.BlockSpec((tq, d), lambda i: (i, 0)),
            ),
            compiler_params=pltpu.CompilerParams(
                dimension_semantics=("parallel",)),
        )(reps)
    else:
        x = reps

    # Pass 2: tiled similarity + online-LSE cross entropy per row.
    kernel = functools.partial(
        _ntxent_tiles_kernel, tq=tq, tk=tk, inv_temp=float(1.0 / temperature))

    row_losses = pl.pallas_call(
        kernel,
        out_shape=jax.ShapeDtypeStruct((n, 1), jnp.float32),
        grid_spec=pltpu.PrefetchScalarGridSpec(
            num_scalar_prefetch=0,
            grid=(nrt, nct),
            in_specs=[
                # query rows for this row tile
                pl.BlockSpec((tq, d), lambda i, j: (i, 0)),
                # key rows for this col tile
                pl.BlockSpec((tk, d), lambda i, j: (j, 0)),
                # partner rows: rows (r + B) mod N for this row tile
                pl.BlockSpec((tq, d), lambda i, j: ((i + half) % nrt, 0)),
            ],
            out_specs=pl.BlockSpec((tq, 1), lambda i, j: (i, 0)),
            scratch_shapes=[
                pltpu.VMEM((tq, 1), jnp.float32),   # running max
                pltpu.VMEM((tq, 1), jnp.float32),   # running exp-sum
            ],
        ),
        compiler_params=pltpu.CompilerParams(
            dimension_semantics=("parallel", "arbitrary")),
    )(x, x, x)

    return jnp.mean(row_losses)


def _ntxent_ref(reps, temperature=0.5, use_cosine_similarity=True):
    """Pure-JAX reference for a sanity check (mirrors the PyTorch module)."""
    x = reps.astype(jnp.float32)
    if use_cosine_similarity:
        x = x / jnp.maximum(jnp.linalg.norm(x, axis=-1, keepdims=True), 1e-12)
    sim = x @ x.T / temperature
    n = x.shape[0]
    sim = jnp.where(jnp.eye(n, dtype=bool), -jnp.inf, sim)
    b = n // 2
    labels = jnp.concatenate([jnp.arange(b) + b, jnp.arange(b)])
    logp = jax.nn.log_softmax(sim, axis=-1)
    return -jnp.mean(logp[jnp.arange(n), labels])


if __name__ == "__main__":
    key = jax.random.PRNGKey(0)
    batch = 8          # batch must be a multiple of 8 (see _pick_row_tile)
    hidden = 32
    reps = jax.random.normal(key, (2 * batch, hidden), dtype=jnp.float32)

    # cosine-similarity path
    loss = ntxent_loss(reps, temperature=0.5, use_cosine_similarity=True)
    jax.block_until_ready(loss)
    ref = _ntxent_ref(reps, temperature=0.5, use_cosine_similarity=True)
    assert jnp.allclose(loss, ref, rtol=1e-4, atol=1e-4), (loss, ref)

    # raw dot-product path
    loss2 = ntxent_loss(reps, temperature=0.7, use_cosine_similarity=False)
    jax.block_until_ready(loss2)
    ref2 = _ntxent_ref(reps, temperature=0.7, use_cosine_similarity=False)
    assert jnp.allclose(loss2, ref2, rtol=1e-4, atol=1e-4), (loss2, ref2)

    print("KERNEL_OK")
</pallas_src>

<mosaic_0001>
module attributes {stable_mosaic.version = 11 : i64} {
  func.func @_l2_normalize_kernel(%arg0: i32, %arg1: memref<8x32xf32, #tpu.memory_space<vmem>>, %arg2: memref<8x32xf32, #tpu.memory_space<vmem>>) attributes {dimension_semantics = [#tpu.dimension_semantics<parallel>], iteration_bounds = array<i64: 2>, scalar_prefetch = 0 : i64, scratch_operands = 0 : i64, tpu.core_type = #tpu.core_type<tc>, window_params = [{transform_indices = @transform_0, window_bounds = array<i64: 8, 32>}, {transform_indices = @transform_1, window_bounds = array<i64: 8, 32>}]} {
    %c0 = arith.constant 0 : index
    %c0_0 = arith.constant 0 : index
    %0 = vector.load %arg1[%c0, %c0_0] : memref<8x32xf32, #tpu.memory_space<vmem>>, vector<8x32xf32>
    %1 = arith.mulf %0, %0 : vector<8x32xf32>
    %cst = arith.constant dense<0.000000e+00> : vector<8xf32>
    %2 = vector.multi_reduction <add>, %1, %cst [1] : vector<8x32xf32> to vector<8xf32>
    %3 = vector.shape_cast %2 : vector<8xf32> to vector<8x1xf32>
    %cst_1 = arith.constant 1.000000e-24 : f32
    %4 = vector.broadcast %cst_1 : f32 to vector<8x1xf32>
    %5 = arith.maximumf %3, %4 : vector<8x1xf32>
    %6 = math.rsqrt %5 : vector<8x1xf32>
    %7 = vector.broadcast %6 : vector<8x1xf32> to vector<8x32xf32>
    %8 = arith.mulf %0, %7 : vector<8x32xf32>
    %c0_2 = arith.constant 0 : index
    %c0_3 = arith.constant 0 : index
    %9 = vector.load %arg2[%c0_2, %c0_3] : memref<8x32xf32, #tpu.memory_space<vmem>>, vector<8x32xf32>
    tpu.vector_store %arg2[%c0_2, %c0_3], %8 {strides = array<i32>} : memref<8x32xf32, #tpu.memory_space<vmem>>, vector<8x32xf32>,
    return
  }
  func.func @transform_0(%arg0: i32) -> (i32, i32) {
    %c0_i32 = arith.constant 0 : i32
    %c0_i32_0 = arith.constant 0 : i32
    return %arg0, %c0_i32 : i32, i32
  }
  func.func @transform_1(%arg0: i32) -> (i32, i32) {
    %c0_i32 = arith.constant 0 : i32
    %c0_i32_0 = arith.constant 0 : i32
    return %arg0, %c0_i32 : i32, i32
  }
}

</mosaic_0001>

<bundles_post_ra>
// kernel: tpu_custom_call.1
= control target key start
LH: loop header
LB: loop body
LE: loop exit
PB: predicated region body
PF: predicated region fallthrough
CT: control target
= control target key end

     0   :  { %6 = vsyncpa [#allocation3], 0  ;;  %s536_s0 = inlined_call_operand.hbm [shape: f32[16,32], index: 0, kind: input, shape index: {}]   ;;  %s537_s1 = inlined_call_operand.hbm [shape: f32[16,32], index: 1, kind: output, shape index: {}]  }
   0x1   :  { %8 = vsyncpa [#allocation3 + $0x1], 0 }
   0x2   :  { %9 = vsyncpa [#allocation4], 0 }
   0x3   :  { %11 = vsyncpa [#allocation4 + $0x1], 0  ;;  %s407_s6 = smov 0   ;;  %s409_s7 = smov 0  }
   0x4   :  { %s411_s8 = smov 0   ;;  %s413_s9 = smov 0  }
   0x5 LB: > { %s428_s10 = sadd.s32 4294967295, %s395_s9   ;;  %s239_s11 = sadd.s32 4294967294, %s395_s9   ;;  %s395_s9 = sphi %s413_s9, %s547_s9   ;;  %s391_s8 = sphi %s411_s8, %s546_s8   ;;  %s387_s7 = sphi %s409_s7, %s545_s7   ;;  %s383_s6 = sphi %s407_s6, %s544_s6  }
   0x6   : > { %s432_s12 = sadd.s32 1, %s395_s9   ;;  %s24_s13 = sadd.s32 1, %s391_s8 }
   0x7   : > { %s21_s14 = ssub.s32 %s395_s9, %s432_s12  ;;  %p31_p0 = scmp.ne.s32.totalorder %s391_s8, %s387_s7 }
   0x8   : > { %p22_p1 = scmp.eq.s32.totalorder %s21_s14, 0  ;;  %p32_p2 = scmp.eq.s32.totalorder %s395_s9, 0 }
   0x9   : > { %p37_p3 = scmp.ne.s32.totalorder %s387_s7, %s383_s6  ;;  %p38_p4 = scmp.eq.s32.totalorder %s428_s10, 0 }
   0xa   : > { %s444_s15 = scalar_select %p22_p1, %s391_s8, %s24_s13  }
   0xb   : > { %p446_p5 = por %p32_p2, %p31_p0  ;;  %p450_p6 = por %p38_p4, %p37_p3 }
   0xc   : > { %p61_p7 = scmp.eq.s32.totalorder %s428_s10, 1  ;;  %p67_p8 = scmp.eq.s32.totalorder %s239_s11, 1 }
   0xd   : > { %p263_p10 = scmp.lt.s32.totalorder %s395_s9, 2  ;;  %s87_s20 = sand.u32 1, %s391_s8  }
   0xe   : > { %p457_p11 = por %p61_p7, %p31_p0  ;;  %p461_p12 = por %p67_p8, %p37_p3 }
   0xf   : > { %s243_s21 = sshll.u32 %s395_s9, 3  ;;  %s242_s22 = sshll.u32 %s87_s20, 3 }
  0x10   : > { %s95_s25 = scalar_lea.hbm %s536_s0, %s243_s21  ;;  %s91_s27 = scalar_lea.vmem [#allocation2], %s242_s22 }
  0x11   : > { %s97_s26 = sshll.u32 %s95_s25, 4  ;;  %s99_s28 = sshll.u32 %s91_s27, 4  ;;  %s98_s26 = int_to_ptr.hbm [resolvable:$true] %s97_s26  ;;  %s100_s28 = int_to_ptr.vmem [resolvable:$true] %s99_s28 }
  0x12   : > { %p472_p13 = pnand %p263_p10, %p446_p5  ;;  %p244_p0 = scmp.ge.s32.totalorder %s395_s9, 1 }
  0x13   : > { %p104_p1 = scmp.lt.s32.totalorder %s395_s9, 3  ;;  %s88_s30 = scalar_lea.sflag [#allocation3], %s87_s20 }
  0x14   : > { %s299_s2 = sshra.s32 %s98_s26, 4  ;;  %p303_p3 = pneg %p472_p13  ;;  %s300_s2 = int_to_ptr.hbm [resolvable:$true] %s299_s2 }
  0x15   : > { %s301_s3 = scalar_lea.hbm %s300_s2, 8  ;;  %s306_s11 = scalar_lea.hbm %s536_s0, 16 }
  0x16   : > { %p302_p2 = scmp.ne.s32.totalorder %s300_s2, %s301_s3  ;;  %p307_p5 = scmp.lt.s32.totalorder %s300_s2, %s536_s0 }
  0x17   : > { %p308_p8 = scmp.lt.s32.totalorder %s306_s11, %s301_s3 }
  0x18   : > { %p304_p4 = pnand %p303_p3, %p302_p2 }
  0x19   : > { %p309_p10 = por %p308_p8, %p307_p5 }
  0x1a   : > { %p305_p7 = pneg %p304_p4 }
  0x1c   : > { %p310_p9 = pnand %p309_p10, %p305_p7 }
  0x1e   : > { %313 = shalt.err (!%p310_p9)
}
  0x1f   : > { %258 = dma.hbm_to_vmem [thread:$0]  (!%p472_p13), %s98_s26, 128, %s100_s28, %s88_s30  }
  0x20   : > { %p105_p2 = pnand %p244_p0, %p104_p1 }
  0x21   : > { %s493_s16 = sand.u32 (!%p105_p2), 1, %s387_s7  }
  0x22   : > { %108 = sbr.rel (%p105_p2) target bundleno = 185 (0xb9), region = 24  ;;  %s245_s20 = sshll.u32 (!%p105_p2), %s493_s16, 3 }
  0x23   : > { %s111_s21 = scalar_lea.sflag (!%p105_p2), [#allocation3], %s493_s16  ;;  %s114_s22 = scalar_lea.vmem (!%p105_p2), [#allocation2], %s245_s20 }
  0x27   : > { %374 = dma.done.wait (%p450_p6), %s111_s21, 128  }
  0x28   : > { %376 = vsyncadd (%p450_p6), %s111_s21, 4294967168  ;;  %v134_v0 = vld [vmem:[%s114_s22] sm:$0xff]  ;;  %vm136_vm0 = vcmask 261120   ;;  %s248_s23 = sshll.u32 %s428_s10, 3  ;;  %s133_s26 = scalar_lea.vmem [#allocation5], %s245_s20 }
  0x29   : > { %v135_v1 = vmul.f32 %v134_v0, %v134_v0  ;;  %s164_s17 = scalar_lea.hbm %s537_s1, %s248_s23  ;;  %s166_s27 = sshll.u32 %s133_s26, 4  ;;  %s167_s27 = int_to_ptr.vmem [resolvable:$true] %s166_s27 }
  0x2a   : > { %s168_s28 = sshll.u32 %s164_s17, 4  ;;  %s154_s10 = scalar_lea.sflag [#allocation4], %s493_s16  ;;  %s169_s28 = int_to_ptr.hbm [resolvable:$true] %s168_s28 }
  0x2b   : > { %v137_v2 = vsel %vm136_vm0, %v135_v1, 0.0  ;;  %s343_s29 = sshra.s32 %s169_s28, 4  ;;  %s349_s4 = scalar_lea.hbm %s537_s1, 16  ;;  %s344_s29 = int_to_ptr.hbm [resolvable:$true] %s343_s29 }
  0x2c   : > { %138 = vadd.xlane.f32.xlu0 %v137_v2  ;;  %s345_s30 = scalar_lea.hbm %s344_s29, 8  ;;  %p350_p0 = scmp.lt.s32.totalorder %s344_s29, %s537_s1 }
  0x2d   : > { %p346_p6 = scmp.ne.s32.totalorder %s344_s29, %s345_s30  ;;  %p351_p1 = scmp.lt.s32.totalorder %s349_s4, %s345_s30 }
  0x2f   : > { %p347_p9 = pnand %p346_p6, %p457_p11  ;;  %p352_p3 = por %p351_p1, %p350_p0 }
  0x31   : > { %p348_p13 = pneg %p347_p9 }
  0x33   : > { %p353_p4 = pnand %p352_p3, %p348_p13 }
  0x9f   : > { %v139_v3 = vpop.xlane.xlu0 %138 }
  0xa0   : > { %v140_v4 = vmax.f32 %v139_v3, 1e-24 }
  0xa2   : > { %297 = vrsqrt.f32 %v140_v4  ;;  %vm147_vm2 = vweird.f32 %v140_v4 }
  0xa8   : > { %v298_v5 = vpop.eup %297 }
  0xa9   : > { %v142_v6 = vmul.f32 %v298_v5, %v140_v4  ;;  %vm148_vm1 = vweird.f32 %v298_v5 }
  0xaa   : > { %vm149_vm3 = vmor %vm147_vm2, %vm148_vm1 }
  0xab   : > { %v143_v7 = vmul.f32 %v298_v5, %v142_v6 }
  0xad   : > { %v144_v8 = vmul.f32 0.5, %v143_v7 }
  0xaf   : > { %v145_v9 = vsub.f32 1.5, %v144_v8 }
  0xb1   : > { %v146_v10 = vmul.f32 %v298_v5, %v145_v9 }
  0xb3   : > { %v150_v11 = vsel %vm149_vm3, %v298_v5, %v146_v10 }
  0xb4   : > { %v151_v12 = vmul.f32 %v150_v11, %v134_v0 }
  0xb6   : > { %152 = vst.msk [vmem:[%s133_s26] sm:$0xff] %vm136_vm0, %v151_v12 }
  0xb7   : > { %356 = shalt.err (!%p353_p4)
}
  0xb8   : > { %253 = dma.vmem_to_hbm [thread:$0]  (%p457_p11), %s167_s27, 128, %s169_s28, %s154_s10  }
  0xb9 PF: > { %s180_s13 = sand.u32 1, %s383_s6   ;;  %p543_p7 = scmp.ge.s32.totalorder %s395_s9, 2 }
  0xba   : > { %s181_s14 = scalar_lea.sflag [#allocation4], %s180_s13 }
  0xbb   : > { %p260_p5 = pnand %p543_p7, %p461_p12 }
  0xbd   : > { %p261_p8 = pneg %p260_p5 }
  0xbf   : > { %378 = dma.done.wait (%p261_p8), %s181_s14, 128  }
  0xc0   : > { %380 = vsyncadd (%p261_p8), %s181_s14, 4294967168  ;;  %p14_p10 = scmp.ge.s32.totalorder %s432_s12, 4   ;;  %s544_s6 = smov %s387_s7 }
  0xc1   : > { %s545_s7 = smov %s391_s8  ;;  %s546_s8 = smov %s444_s15 }
  0xc2   : > { %s547_s9 = smov %s432_s12  ;;  %16 = sbr.rel (!%p14_p10) target bundleno = 5 (0x5), region = 69 }
  0xc7   :  { %187 = vsyncpa [#allocation3], 1 }
  0xc8   :  { %189 = vsyncpa [#allocation3 + $0x1], 1 }
  0xc9   :  { %190 = vsyncpa [#allocation4], 1 }
  0xca   :  { %192 = vsyncpa [#allocation4 + $0x1], 1 }

</bundles_post_ra>
